<compile_context>
chip_gen: v7x
topology: tpu7x:2x2x1
jax: 0.10.0
libtpu: 0.0.40
codegen_flags: <defaults>
</compile_context>

<pallas_src>
import math
import functools

import jax
import jax.numpy as jnp
from jax.experimental import pallas as pl
from jax.experimental.pallas import tpu as pltpu


def _round_up(x, m):
    return ((x + m - 1) // m) * m


def _decoder_kernel(eln_ref, mask_ref, qf_ref, k_ref, v_ref, shk_ref,
                    wq_last_ref, new_ref, newb_ref, new2_ref, newb2_ref,
                    mhc_w_ref, mhc_b_ref, out_ref, slab_ref,
                    *, head_num, qkv_dim, sqrt_embedding_dim, logit_clipping):
    D = qkv_dim
    inv_sqrt_d = 1.0 / math.sqrt(D)
    bf16 = jnp.bfloat16

    def masked_softmax(s):
        # s already has the -inf mask added; guard fully-masked rows -> zeros.
        m = jnp.max(s, axis=-1, keepdims=True)
        m_safe = jnp.where(m == -jnp.inf, 0.0, m)
        e = jnp.exp(s - m_safe)
        denom = jnp.sum(e, axis=-1, keepdims=True)
        inv = jnp.where(denom > 0.0, pl.reciprocal(denom, approx=True), 0.0)
        return e * inv

    mask = mask_ref[0]                                          # (pomo_t, problem_p) f32

    # q_last = Wq_last(encoded_last_node); single dense add of q_first.
    q_last = jnp.dot(eln_ref[0], wq_last_ref[...],
                     preferred_element_type=jnp.float32)        # (pomo_t, hd) f32
    q = qf_ref[0] + q_last                                      # lane-dense f32 add
    q_bf = q.astype(bf16)

    # Multi-head attention; heads land in a lane-dense (pomo_t, hd) scratch slab.
    for h in range(head_num):
        k_h = k_ref[0, h]                                       # (D, problem_p)  bf16
        v_h = v_ref[0, h]                                       # (problem_p, D)  bf16
        s = jnp.dot(q_bf[:, h * D:(h + 1) * D], k_h,
                    preferred_element_type=jnp.float32) * inv_sqrt_d
        w = masked_softmax(s + mask)                            # f32
        slab_ref[:, h * D:(h + 1) * D] = jnp.dot(
            w.astype(bf16), v_h, preferred_element_type=jnp.float32)

    out_concat = slab_ref[...]                                  # (pomo_t, hd) f32
    residual = out_concat

    # EAS added layers (per-batch weights); bf16 MXU operands, f32 elementwise.
    h1 = jnp.dot(out_concat.astype(bf16), new_ref[0],
                 preferred_element_type=jnp.float32) + newb_ref[0]
    h1 = jnp.maximum(h1, 0.0)                                   # ReLU
    h2 = jnp.dot(h1.astype(bf16), new2_ref[0],
                 preferred_element_type=jnp.float32) + newb2_ref[0]
    h2 = h2 + residual

    # multi_head_combine (shared Linear with bias)
    mh = jnp.dot(h2.astype(bf16), mhc_w_ref[...],
                 preferred_element_type=jnp.float32) + mhc_b_ref[...]

    # single-head scoring against encoded nodes, clip, mask, softmax
    score = jnp.dot(mh.astype(bf16), shk_ref[0],
                    preferred_element_type=jnp.float32)         # (pomo_t, problem_p)
    score_clipped = logit_clipping * jnp.tanh(score * (1.0 / sqrt_embedding_dim))
    out_ref[0] = masked_softmax(score_clipped + mask).astype(out_ref.dtype)


def prob_calc_forward(encoded_last_node, ninf_mask, q_first, k_t, v, single_head_key,
                      wq_last, new, new_bias, new_2, new_bias_2, mhc_w, mhc_b,
                      *, sqrt_embedding_dim, logit_clipping):
    """Pallas forward of prob_calc_added_layers_TSP.

    encoded_last_node : (B, pomo, emb)             f32
    ninf_mask         : (B, pomo, problem)         f32, entries 0 or -inf
    q_first           : (B, pomo, head*qkv)        flat (lane-dense) q_first
    k_t               : (B, head, qkv, problem)    pre-transposed keys
    v                 : (B, head, problem, qkv)
    single_head_key   : (B, emb, problem)
    wq_last (emb,hd), new/new_2 (B,hd,hd), new_bias/new_bias_2 (B,1,hd),
    mhc_w (hd,emb), mhc_b (1,emb).   Linear weights stored as (in, out).
    """
    B, pomo, emb = encoded_last_node.shape
    _, head_num, qkv_dim, problem = k_t.shape
    hd = head_num * qkv_dim

    # Lane/sublane-dense padding.
    problem_p = _round_up(problem, 128)
    pomo_t = min(128, _round_up(pomo, 8))
    pomo_p = _round_up(pomo, pomo_t)
    n_pomo_tiles = pomo_p // pomo_t

    f32, bf16 = jnp.float32, jnp.bfloat16

    def pad_to(x, shape, value=0.0):
        pads = [(0, t - s) for s, t in zip(x.shape, shape)]
        if all(p == (0, 0) for p in pads):
            return x
        return jnp.pad(x, pads, constant_values=value)

    eln_p = pad_to(encoded_last_node.astype(f32), (B, pomo_p, emb)).astype(bf16)
    mask_p = pad_to(ninf_mask.astype(f32), (B, pomo_p, problem_p), value=-jnp.inf)
    qf_p = pad_to(q_first.astype(f32), (B, pomo_p, hd))
    k_p = pad_to(k_t.astype(f32), (B, head_num, qkv_dim, problem_p)).astype(bf16)
    v_p = pad_to(v.astype(f32), (B, head_num, problem_p, qkv_dim)).astype(bf16)
    shk_p = pad_to(single_head_key.astype(f32), (B, emb, problem_p)).astype(bf16)
    wq_b = wq_last.astype(bf16)
    new_b = new.astype(bf16)
    new2_b = new_2.astype(bf16)
    mhc_w_b = mhc_w.astype(bf16)
    newb_f = new_bias.astype(f32)
    newb2_f = new_bias_2.astype(f32)
    mhc_b_f = mhc_b.astype(f32)

    kernel = functools.partial(
        _decoder_kernel,
        head_num=head_num, qkv_dim=qkv_dim,
        sqrt_embedding_dim=float(sqrt_embedding_dim),
        logit_clipping=float(logit_clipping))

    in_specs = [
        pl.BlockSpec((1, pomo_t, emb), lambda b, p: (b, p, 0)),                     # encoded_last_node
        pl.BlockSpec((1, pomo_t, problem_p), lambda b, p: (b, p, 0)),               # ninf_mask
        pl.BlockSpec((1, pomo_t, hd), lambda b, p: (b, p, 0)),                      # q_first (flat)
        pl.BlockSpec((1, head_num, qkv_dim, problem_p), lambda b, p: (b, 0, 0, 0)),  # k (pre-T)
        pl.BlockSpec((1, head_num, problem_p, qkv_dim), lambda b, p: (b, 0, 0, 0)),  # v
        pl.BlockSpec((1, emb, problem_p), lambda b, p: (b, 0, 0)),                  # single_head_key
        pl.BlockSpec((emb, hd), lambda b, p: (0, 0)),                               # Wq_last
        pl.BlockSpec((1, hd, hd), lambda b, p: (b, 0, 0)),                          # new
        pl.BlockSpec((1, 1, hd), lambda b, p: (b, 0, 0)),                           # new_bias
        pl.BlockSpec((1, hd, hd), lambda b, p: (b, 0, 0)),                          # new_2
        pl.BlockSpec((1, 1, hd), lambda b, p: (b, 0, 0)),                           # new_bias_2
        pl.BlockSpec((hd, emb), lambda b, p: (0, 0)),                               # mhc weight
        pl.BlockSpec((1, emb), lambda b, p: (0, 0)),                                # mhc bias
    ]
    out_specs = pl.BlockSpec((1, pomo_t, problem_p), lambda b, p: (b, p, 0))

    grid_spec = pltpu.PrefetchScalarGridSpec(
        num_scalar_prefetch=0,
        grid=(B, n_pomo_tiles),
        in_specs=in_specs,
        out_specs=out_specs,
        scratch_shapes=[pltpu.VMEM((pomo_t, hd), jnp.float32)],
    )

    # Advisory cost estimate (helps XLA overlap the set_kv/set_q1 glue matmuls).
    flops = 2 * B * pomo_p * (emb * hd + 2 * hd * problem_p + 2 * hd * hd
                              + hd * emb + emb * problem_p)
    transcendentals = B * pomo_p * problem_p * (head_num + 2)
    all_inputs = (eln_p, mask_p, qf_p, k_p, v_p, shk_p, wq_b, new_b, newb_f,
                  new2_b, newb2_f, mhc_w_b, mhc_b_f)
    bytes_accessed = int(sum(int(x.size) * x.dtype.itemsize for x in all_inputs)
                         + B * pomo_p * problem_p * 4)
    cost = pl.CostEstimate(flops=int(flops), transcendentals=int(transcendentals),
                           bytes_accessed=bytes_accessed)

    # Per-step VMEM working set (double-buffered) -> bump the scoped limit if needed,
    # keeping headroom under v7x's 64 MiB physical VMEM.
    per_step_bytes = (
        pomo_t * emb * 2 + pomo_t * problem_p * 4 + pomo_t * hd * 4
        + head_num * qkv_dim * problem_p * 2 * 2
        + emb * problem_p * 2 + emb * hd * 2 + 2 * hd * hd * 2
        + 2 * hd * 4 + hd * emb * 2 + emb * 4 + pomo_t * problem_p * 4)
    vmem_limit = min(max(2 * per_step_bytes + (4 << 20), 32 << 20), 56 << 20)

    compiler_params = pltpu.CompilerParams(
        dimension_semantics=("parallel", "parallel"),
        vmem_limit_bytes=int(vmem_limit),
    )

    probs_p = pl.pallas_call(
        kernel,
        grid_spec=grid_spec,
        out_shape=jax.ShapeDtypeStruct((B, pomo_p, problem_p), jnp.float32),
        compiler_params=compiler_params,
        cost_estimate=cost,
    )(eln_p, mask_p, qf_p, k_p, v_p, shk_p, wq_b, new_b, newb_f,
      new2_b, newb2_f, mhc_w_b, mhc_b_f)

    return probs_p[:, :pomo, :problem]


def _reshape_by_heads(x, head_num):
    # (B, n, head*D) -> (B, head, n, D)
    B, n, _ = x.shape
    return x.reshape(B, n, head_num, -1).transpose(0, 2, 1, 3)


def _reference(encoded_last_node, ninf_mask, q_first_flat, k_t, v, single_head_key,
               wq_last, new, new_bias, new_2, new_bias_2, mhc_w, mhc_b,
               sqrt_embedding_dim, logit_clipping, head_num, qkv_dim):
    # Pure-JAX f32 reference matching the PyTorch forward.
    q_last = _reshape_by_heads(encoded_last_node @ wq_last, head_num)
    q_first = _reshape_by_heads(q_first_flat, head_num)
    q = q_first + q_last
    s = jnp.einsum('bhqd,bhdk->bhqk', q, k_t) / math.sqrt(qkv_dim)
    s = s + ninf_mask[:, None, :, :]
    w = jax.nn.softmax(s, axis=3)
    out = jnp.einsum('bhqk,bhkd->bhqd', w, v)
    B, H, n, D = out.shape
    out_concat = out.transpose(0, 2, 1, 3).reshape(B, n, H * D)
    residual = out_concat
    out_concat = jax.nn.relu(jnp.matmul(out_concat, new) + new_bias)
    out_concat = jnp.matmul(out_concat, new_2) + new_bias_2
    out_concat = out_concat + residual
    mh = out_concat @ mhc_w + mhc_b
    score = jnp.matmul(mh, single_head_key)
    score_clipped = logit_clipping * jnp.tanh(score / sqrt_embedding_dim)
    return jax.nn.softmax(score_clipped + ninf_mask, axis=2)


if __name__ == "__main__":
    key = jax.random.PRNGKey(0)
    batch_s, pomo, problem = 2, 8, 16
    embedding_dim, head_num, qkv_dim = 32, 4, 8
    hd = head_num * qkv_dim
    sqrt_embedding_dim = math.sqrt(embedding_dim)
    logit_clipping = 10.0

    ks = jax.random.split(key, 14)
    scale = 1.0 / math.sqrt(embedding_dim)
    # Linear weights stored as (in, out) so the kernel does x @ W.
    Wq_first = jax.random.uniform(ks[0], (embedding_dim, hd), jnp.float32, -scale, scale)
    Wq_last = jax.random.uniform(ks[1], (embedding_dim, hd), jnp.float32, -scale, scale)
    Wk = jax.random.uniform(ks[2], (embedding_dim, hd), jnp.float32, -scale, scale)
    Wv = jax.random.uniform(ks[3], (embedding_dim, hd), jnp.float32, -scale, scale)
    mhc_w = jax.random.uniform(ks[4], (hd, embedding_dim), jnp.float32, -scale, scale)
    mhc_b = jax.random.uniform(ks[5], (1, embedding_dim), jnp.float32, -scale, scale)

    # EAS added layers (per-batch weights).  new/new_bias xavier-style; new_2 /
    # new_bias_2 are zero at torch init but given small non-zero values here so
    # the test actually exercises the second added layer (training moves them
    # off zero in real EAS runs).
    bound_new = math.sqrt(6.0 / (hd * hd + batch_s * hd))
    new = jax.random.uniform(ks[6], (batch_s, hd, hd), jnp.float32, -bound_new, bound_new)
    bound_nb = math.sqrt(6.0 / (hd + batch_s * hd))
    new_bias = jax.random.uniform(ks[7], (batch_s, 1, hd), jnp.float32, -bound_nb, bound_nb)
    new_2 = jax.random.uniform(ks[12], (batch_s, hd, hd), jnp.float32,
                               -0.5 * bound_new, 0.5 * bound_new)
    new_bias_2 = jax.random.uniform(ks[13], (batch_s, 1, hd), jnp.float32,
                                    -0.5 * bound_nb, 0.5 * bound_nb)

    # Inputs
    encoded_nodes = jax.random.normal(ks[8], (batch_s, problem, embedding_dim), jnp.float32)
    encoded_q1 = jax.random.normal(ks[9], (batch_s, pomo, embedding_dim), jnp.float32)
    encoded_last_node = jax.random.normal(ks[10], (batch_s, pomo, embedding_dim), jnp.float32)
    mask_draw = jax.random.uniform(ks[11], (batch_s, pomo, problem))
    ninf_mask = jnp.where(mask_draw < 0.3, -jnp.inf, 0.0).astype(jnp.float32)
    ninf_mask = ninf_mask.at[:, :, 0].set(0.0)  # keep at least one unmasked node per row

    # set_kv / set_q1 state precompute (plain JAX glue, as in the torch module),
    # using the kernel-friendly layouts: k pre-transposed, q_first kept flat.
    k_heads = _reshape_by_heads(encoded_nodes @ Wk, head_num)       # (B, H, problem, D)
    v_heads = _reshape_by_heads(encoded_nodes @ Wv, head_num)       # (B, H, problem, D)
    k_t = jnp.transpose(k_heads, (0, 1, 3, 2))                      # (B, H, D, problem)
    single_head_key = jnp.transpose(encoded_nodes, (0, 2, 1))       # (B, emb, problem)
    q_first_flat = encoded_q1 @ Wq_first                            # (B, pomo, hd)

    probs = prob_calc_forward(
        encoded_last_node, ninf_mask, q_first_flat, k_t, v_heads, single_head_key,
        Wq_last, new, new_bias, new_2, new_bias_2, mhc_w, mhc_b,
        sqrt_embedding_dim=sqrt_embedding_dim, logit_clipping=logit_clipping)
    probs = jax.block_until_ready(probs)

    ref = _reference(
        encoded_last_node, ninf_mask, q_first_flat, k_t, v_heads, single_head_key,
        Wq_last, new, new_bias, new_2, new_bias_2, mhc_w, mhc_b,
        sqrt_embedding_dim, logit_clipping, head_num, qkv_dim)

    assert probs.shape == (batch_s, pomo, problem)
    assert bool(jnp.all(jnp.isfinite(probs))), "non-finite probs"
    assert bool(jnp.allclose(jnp.sum(probs, axis=-1), 1.0, atol=1e-2)), "probs don't sum to 1"
    # bf16 MXU operands (f32 accumulation) => loosened tolerance vs the f32 reference.
    assert bool(jnp.allclose(probs, ref, rtol=3e-2, atol=1e-2)), "mismatch vs reference"

    print("KERNEL_OK")
</pallas_src>

<mosaic_0001>
module attributes {stable_mosaic.version = 11 : i64} {
  func.func @_decoder_kernel(%arg0: i32, %arg1: i32, %arg2: memref<1x8x32xbf16, #tpu.memory_space<vmem>>, %arg3: memref<1x8x128xf32, #tpu.memory_space<vmem>>, %arg4: memref<1x8x32xf32, #tpu.memory_space<vmem>>, %arg5: memref<1x4x8x128xbf16, #tpu.memory_space<vmem>>, %arg6: memref<1x4x128x8xbf16, #tpu.memory_space<vmem>>, %arg7: memref<1x32x128xbf16, #tpu.memory_space<vmem>>, %arg8: memref<32x32xbf16, #tpu.memory_space<vmem>>, %arg9: memref<1x32x32xbf16, #tpu.memory_space<vmem>>, %arg10: memref<1x1x32xf32, #tpu.memory_space<vmem>>, %arg11: memref<1x32x32xbf16, #tpu.memory_space<vmem>>, %arg12: memref<1x1x32xf32, #tpu.memory_space<vmem>>, %arg13: memref<32x32xbf16, #tpu.memory_space<vmem>>, %arg14: memref<1x32xf32, #tpu.memory_space<vmem>>, %arg15: memref<1x8x128xf32, #tpu.memory_space<vmem>>, %arg16: memref<8x32xf32, #tpu.memory_space<vmem>>) attributes {dimension_semantics = [#tpu.dimension_semantics<parallel>, #tpu.dimension_semantics<parallel>], iteration_bounds = array<i64: 2, 1>, scalar_prefetch = 0 : i64, scratch_operands = 1 : i64, tpu.core_type = #tpu.core_type<tc>, window_params = [{transform_indices = @transform_0, window_bounds = array<i64: 1, 8, 32>}, {transform_indices = @transform_1, window_bounds = array<i64: 1, 8, 128>}, {transform_indices = @transform_2, window_bounds = array<i64: 1, 8, 32>}, {transform_indices = @transform_3, window_bounds = array<i64: 1, 4, 8, 128>}, {transform_indices = @transform_4, window_bounds = array<i64: 1, 4, 128, 8>}, {transform_indices = @transform_5, window_bounds = array<i64: 1, 32, 128>}, {pipeline_mode = #tpu.pipeline_mode<synchronous>, transform_indices = @transform_6, window_bounds = array<i64: 32, 32>}, {transform_indices = @transform_7, window_bounds = array<i64: 1, 32, 32>}, {transform_indices = @transform_8, window_bounds = array<i64: 1, 1, 32>}, {transform_indices = @transform_9, window_bounds = array<i64: 1, 32, 32>}, {transform_indices = @transform_10, window_bounds = array<i64: 1, 1, 32>}, {pipeline_mode = #tpu.pipeline_mode<synchronous>, transform_indices = @transform_11, window_bounds = array<i64: 32, 32>}, {pipeline_mode = #tpu.pipeline_mode<synchronous>, transform_indices = @transform_12, window_bounds = array<i64: 1, 32>}, {transform_indices = @transform_13, window_bounds = array<i64: 1, 8, 128>}]} {
    %c0 = arith.constant 0 : index
    %c0_0 = arith.constant 0 : index
    %c0_1 = arith.constant 0 : index
    %0 = vector.load %arg3[%c0, %c0_0, %c0_1] : memref<1x8x128xf32, #tpu.memory_space<vmem>>, vector<1x8x128xf32>
    %1 = vector.shape_cast %0 : vector<1x8x128xf32> to vector<8x128xf32>
    %c0_2 = arith.constant 0 : index
    %c0_3 = arith.constant 0 : index
    %c0_4 = arith.constant 0 : index
    %2 = vector.load %arg2[%c0_2, %c0_3, %c0_4] : memref<1x8x32xbf16, #tpu.memory_space<vmem>>, vector<1x8x32xbf16>
    %3 = vector.shape_cast %2 : vector<1x8x32xbf16> to vector<8x32xbf16>
    %c0_5 = arith.constant 0 : index
    %c0_6 = arith.constant 0 : index
    %4 = vector.load %arg8[%c0_5, %c0_6] : memref<32x32xbf16, #tpu.memory_space<vmem>>, vector<32x32xbf16>
    %cst = arith.constant dense<0.000000e+00> : vector<8x32xf32>
    %5 = tpu.matmul %3, %4, %cst {dimension_numbers = #tpu.dot_dimension_numbers<[1], [0], [0], [1], [0, 0, 1, 1], [], []>} : vector<8x32xbf16>, vector<32x32xbf16>, vector<8x32xf32> -> vector<8x32xf32>
    %c0_7 = arith.constant 0 : index
    %c0_8 = arith.constant 0 : index
    %c0_9 = arith.constant 0 : index
    %6 = vector.load %arg4[%c0_7, %c0_8, %c0_9] : memref<1x8x32xf32, #tpu.memory_space<vmem>>, vector<1x8x32xf32>
    %7 = vector.shape_cast %6 : vector<1x8x32xf32> to vector<8x32xf32>
    %8 = arith.addf %7, %5 : vector<8x32xf32>
    %9 = arith.truncf %8 : vector<8x32xf32> to vector<8x32xbf16>
    %c0_10 = arith.constant 0 : index
    %c0_11 = arith.constant 0 : index
    %c0_12 = arith.constant 0 : index
    %c0_13 = arith.constant 0 : index
    %10 = vector.load %arg5[%c0_10, %c0_11, %c0_12, %c0_13] : memref<1x4x8x128xbf16, #tpu.memory_space<vmem>>, vector<1x1x8x128xbf16>
    %11 = vector.shape_cast %10 : vector<1x1x8x128xbf16> to vector<8x128xbf16>
    %c0_14 = arith.constant 0 : index
    %c0_15 = arith.constant 0 : index
    %c0_16 = arith.constant 0 : index
    %c0_17 = arith.constant 0 : index
    %12 = vector.load %arg6[%c0_14, %c0_15, %c0_16, %c0_17] : memref<1x4x128x8xbf16, #tpu.memory_space<vmem>>, vector<1x1x128x8xbf16>
    %13 = vector.shape_cast %12 : vector<1x1x128x8xbf16> to vector<128x8xbf16>
    %14 = vector.extract_strided_slice %9 {offsets = [0, 0], sizes = [8, 8], strides = [1, 1]} : vector<8x32xbf16> to vector<8x8xbf16>
    %cst_18 = arith.constant dense<0.000000e+00> : vector<8x128xf32>
    %15 = tpu.matmul %14, %11, %cst_18 {dimension_numbers = #tpu.dot_dimension_numbers<[1], [0], [0], [1], [0, 0, 1, 1], [], []>} : vector<8x8xbf16>, vector<8x128xbf16>, vector<8x128xf32> -> vector<8x128xf32>
    %cst_19 = arith.constant 0.353553385 : f32
    %16 = vector.broadcast %cst_19 : f32 to vector<8x128xf32>
    %17 = arith.mulf %15, %16 : vector<8x128xf32>
    %18 = arith.addf %17, %1 : vector<8x128xf32>
    %cst_20 = arith.constant dense<0xFF800000> : vector<8xf32>
    %19 = vector.multi_reduction <maximumf>, %18, %cst_20 [1] : vector<8x128xf32> to vector<8xf32>
    %20 = vector.shape_cast %19 : vector<8xf32> to vector<8x1xf32>
    %cst_21 = arith.constant 0xFF800000 : f32
    %21 = vector.broadcast %cst_21 : f32 to vector<8x1xf32>
    %22 = arith.cmpf oeq, %20, %21 : vector<8x1xf32>
    %cst_22 = arith.constant 0.000000e+00 : f32
    %23 = vector.broadcast %cst_22 : f32 to vector<8x1xf32>
    %24 = arith.select %22, %23, %20 : vector<8x1xi1>, vector<8x1xf32>
    %25 = vector.broadcast %24 : vector<8x1xf32> to vector<8x128xf32>
    %26 = arith.subf %18, %25 : vector<8x128xf32>
    %27 = math.exp %26 : vector<8x128xf32>
    %cst_23 = arith.constant dense<0.000000e+00> : vector<8xf32>
    %28 = vector.multi_reduction <add>, %27, %cst_23 [1] : vector<8x128xf32> to vector<8xf32>
    %29 = vector.shape_cast %28 : vector<8xf32> to vector<8x1xf32>
    %cst_24 = arith.constant 0.000000e+00 : f32
    %30 = vector.broadcast %cst_24 : f32 to vector<8x1xf32>
    %31 = arith.cmpf ogt, %29, %30 : vector<8x1xf32>
    %32 = tpu.reciprocal %29 {approx = true} : vector<8x1xf32> -> vector<8x1xf32>
    %cst_25 = arith.constant 0.000000e+00 : f32
    %33 = vector.broadcast %cst_25 : f32 to vector<8x1xf32>
    %34 = arith.select %31, %32, %33 : vector<8x1xi1>, vector<8x1xf32>
    %35 = vector.broadcast %34 : vector<8x1xf32> to vector<8x128xf32>
    %36 = arith.mulf %27, %35 : vector<8x128xf32>
    %37 = arith.truncf %36 : vector<8x128xf32> to vector<8x128xbf16>
    %cst_26 = arith.constant dense<0.000000e+00> : vector<8x8xf32>
    %38 = tpu.matmul %37, %13, %cst_26 {dimension_numbers = #tpu.dot_dimension_numbers<[1], [0], [0], [1], [0, 0, 1, 1], [], []>} : vector<8x128xbf16>, vector<128x8xbf16>, vector<8x8xf32> -> vector<8x8xf32>
    %c0_27 = arith.constant 0 : index
    %c0_28 = arith.constant 0 : index
    %39 = vector.load %arg16[%c0_27, %c0_28] : memref<8x32xf32, #tpu.memory_space<vmem>>, vector<8x8xf32>
    tpu.vector_store %arg16[%c0_27, %c0_28], %38 {strides = array<i32>} : memref<8x32xf32, #tpu.memory_space<vmem>>, vector<8x8xf32>,
    %c0_29 = arith.constant 0 : index
    %c1 = arith.constant 1 : index
    %c0_30 = arith.constant 0 : index
    %c0_31 = arith.constant 0 : index
    %40 = vector.load %arg5[%c0_29, %c1, %c0_30, %c0_31] : memref<1x4x8x128xbf16, #tpu.memory_space<vmem>>, vector<1x1x8x128xbf16>
    %41 = vector.shape_cast %40 : vector<1x1x8x128xbf16> to vector<8x128xbf16>
    %c0_32 = arith.constant 0 : index
    %c1_33 = arith.constant 1 : index
    %c0_34 = arith.constant 0 : index
    %c0_35 = arith.constant 0 : index
    %42 = vector.load %arg6[%c0_32, %c1_33, %c0_34, %c0_35] : memref<1x4x128x8xbf16, #tpu.memory_space<vmem>>, vector<1x1x128x8xbf16>
    %43 = vector.shape_cast %42 : vector<1x1x128x8xbf16> to vector<128x8xbf16>
    %44 = vector.extract_strided_slice %9 {offsets = [0, 8], sizes = [8, 8], strides = [1, 1]} : vector<8x32xbf16> to vector<8x8xbf16>
    %cst_36 = arith.constant dense<0.000000e+00> : vector<8x128xf32>
    %45 = tpu.matmul %44, %41, %cst_36 {dimension_numbers = #tpu.dot_dimension_numbers<[1], [0], [0], [1], [0, 0, 1, 1], [], []>} : vector<8x8xbf16>, vector<8x128xbf16>, vector<8x128xf32> -> vector<8x128xf32>
    %cst_37 = arith.constant 0.353553385 : f32
    %46 = vector.broadcast %cst_37 : f32 to vector<8x128xf32>
    %47 = arith.mulf %45, %46 : vector<8x128xf32>
    %48 = arith.addf %47, %1 : vector<8x128xf32>
    %cst_38 = arith.constant dense<0xFF800000> : vector<8xf32>
    %49 = vector.multi_reduction <maximumf>, %48, %cst_38 [1] : vector<8x128xf32> to vector<8xf32>
    %50 = vector.shape_cast %49 : vector<8xf32> to vector<8x1xf32>
    %cst_39 = arith.constant 0xFF800000 : f32
    %51 = vector.broadcast %cst_39 : f32 to vector<8x1xf32>
    %52 = arith.cmpf oeq, %50, %51 : vector<8x1xf32>
    %cst_40 = arith.constant 0.000000e+00 : f32
    %53 = vector.broadcast %cst_40 : f32 to vector<8x1xf32>
    %54 = arith.select %52, %53, %50 : vector<8x1xi1>, vector<8x1xf32>
    %55 = vector.broadcast %54 : vector<8x1xf32> to vector<8x128xf32>
    %56 = arith.subf %48, %55 : vector<8x128xf32>
    %57 = math.exp %56 : vector<8x128xf32>
    %cst_41 = arith.constant dense<0.000000e+00> : vector<8xf32>
    %58 = vector.multi_reduction <add>, %57, %cst_41 [1] : vector<8x128xf32> to vector<8xf32>
    %59 = vector.shape_cast %58 : vector<8xf32> to vector<8x1xf32>
    %cst_42 = arith.constant 0.000000e+00 : f32
    %60 = vector.broadcast %cst_42 : f32 to vector<8x1xf32>
    %61 = arith.cmpf ogt, %59, %60 : vector<8x1xf32>
    %62 = tpu.reciprocal %59 {approx = true} : vector<8x1xf32> -> vector<8x1xf32>
    %cst_43 = arith.constant 0.000000e+00 : f32
    %63 = vector.broadcast %cst_43 : f32 to vector<8x1xf32>
    %64 = arith.select %61, %62, %63 : vector<8x1xi1>, vector<8x1xf32>
    %65 = vector.broadcast %64 : vector<8x1xf32> to vector<8x128xf32>
    %66 = arith.mulf %57, %65 : vector<8x128xf32>
    %67 = arith.truncf %66 : vector<8x128xf32> to vector<8x128xbf16>
    %cst_44 = arith.constant dense<0.000000e+00> : vector<8x8xf32>
    %68 = tpu.matmul %67, %43, %cst_44 {dimension_numbers = #tpu.dot_dimension_numbers<[1], [0], [0], [1], [0, 0, 1, 1], [], []>} : vector<8x128xbf16>, vector<128x8xbf16>, vector<8x8xf32> -> vector<8x8xf32>
    %c0_45 = arith.constant 0 : index
    %c8 = arith.constant 8 : index
    %69 = vector.load %arg16[%c0_45, %c8] : memref<8x32xf32, #tpu.memory_space<vmem>>, vector<8x8xf32>
    tpu.vector_store %arg16[%c0_45, %c8], %68 {strides = array<i32>} : memref<8x32xf32, #tpu.memory_space<vmem>>, vector<8x8xf32>,
    %c0_46 = arith.constant 0 : index
    %c2 = arith.constant 2 : index
    %c0_47 = arith.constant 0 : index
    %c0_48 = arith.constant 0 : index
    %70 = vector.load %arg5[%c0_46, %c2, %c0_47, %c0_48] : memref<1x4x8x128xbf16, #tpu.memory_space<vmem>>, vector<1x1x8x128xbf16>
    %71 = vector.shape_cast %70 : vector<1x1x8x128xbf16> to vector<8x128xbf16>
    %c0_49 = arith.constant 0 : index
    %c2_50 = arith.constant 2 : index
    %c0_51 = arith.constant 0 : index
    %c0_52 = arith.constant 0 : index
    %72 = vector.load %arg6[%c0_49, %c2_50, %c0_51, %c0_52] : memref<1x4x128x8xbf16, #tpu.memory_space<vmem>>, vector<1x1x128x8xbf16>
    %73 = vector.shape_cast %72 : vector<1x1x128x8xbf16> to vector<128x8xbf16>
    %74 = vector.extract_strided_slice %9 {offsets = [0, 16], sizes = [8, 8], strides = [1, 1]} : vector<8x32xbf16> to vector<8x8xbf16>
    %cst_53 = arith.constant dense<0.000000e+00> : vector<8x128xf32>
    %75 = tpu.matmul %74, %71, %cst_53 {dimension_numbers = #tpu.dot_dimension_numbers<[1], [0], [0], [1], [0, 0, 1, 1], [], []>} : vector<8x8xbf16>, vector<8x128xbf16>, vector<8x128xf32> -> vector<8x128xf32>
    %cst_54 = arith.constant 0.353553385 : f32
    %76 = vector.broadcast %cst_54 : f32 to vector<8x128xf32>
    %77 = arith.mulf %75, %76 : vector<8x128xf32>
    %78 = arith.addf %77, %1 : vector<8x128xf32>
    %cst_55 = arith.constant dense<0xFF800000> : vector<8xf32>
    %79 = vector.multi_reduction <maximumf>, %78, %cst_55 [1] : vector<8x128xf32> to vector<8xf32>
    %80 = vector.shape_cast %79 : vector<8xf32> to vector<8x1xf32>
    %cst_56 = arith.constant 0xFF800000 : f32
    %81 = vector.broadcast %cst_56 : f32 to vector<8x1xf32>
    %82 = arith.cmpf oeq, %80, %81 : vector<8x1xf32>
    %cst_57 = arith.constant 0.000000e+00 : f32
    %83 = vector.broadcast %cst_57 : f32 to vector<8x1xf32>
    %84 = arith.select %82, %83, %80 : vector<8x1xi1>, vector<8x1xf32>
    %85 = vector.broadcast %84 : vector<8x1xf32> to vector<8x128xf32>
    %86 = arith.subf %78, %85 : vector<8x128xf32>
    %87 = math.exp %86 : vector<8x128xf32>
    %cst_58 = arith.constant dense<0.000000e+00> : vector<8xf32>
    %88 = vector.multi_reduction <add>, %87, %cst_58 [1] : vector<8x128xf32> to vector<8xf32>
    %89 = vector.shape_cast %88 : vector<8xf32> to vector<8x1xf32>
    %cst_59 = arith.constant 0.000000e+00 : f32
    %90 = vector.broadcast %cst_59 : f32 to vector<8x1xf32>
    %91 = arith.cmpf ogt, %89, %90 : vector<8x1xf32>
    %92 = tpu.reciprocal %89 {approx = true} : vector<8x1xf32> -> vector<8x1xf32>
    %cst_60 = arith.constant 0.000000e+00 : f32
    %93 = vector.broadcast %cst_60 : f32 to vector<8x1xf32>
    %94 = arith.select %91, %92, %93 : vector<8x1xi1>, vector<8x1xf32>
    %95 = vector.broadcast %94 : vector<8x1xf32> to vector<8x128xf32>
    %96 = arith.mulf %87, %95 : vector<8x128xf32>
    %97 = arith.truncf %96 : vector<8x128xf32> to vector<8x128xbf16>
    %cst_61 = arith.constant dense<0.000000e+00> : vector<8x8xf32>
    %98 = tpu.matmul %97, %73, %cst_61 {dimension_numbers = #tpu.dot_dimension_numbers<[1], [0], [0], [1], [0, 0, 1, 1], [], []>} : vector<8x128xbf16>, vector<128x8xbf16>, vector<8x8xf32> -> vector<8x8xf32>
    %c0_62 = arith.constant 0 : index
    %c16 = arith.constant 16 : index
    %99 = vector.load %arg16[%c0_62, %c16] : memref<8x32xf32, #tpu.memory_space<vmem>>, vector<8x8xf32>
    tpu.vector_store %arg16[%c0_62, %c16], %98 {strides = array<i32>} : memref<8x32xf32, #tpu.memory_space<vmem>>, vector<8x8xf32>,
    %c0_63 = arith.constant 0 : index
    %c3 = arith.constant 3 : index
    %c0_64 = arith.constant 0 : index
    %c0_65 = arith.constant 0 : index
    %100 = vector.load %arg5[%c0_63, %c3, %c0_64, %c0_65] : memref<1x4x8x128xbf16, #tpu.memory_space<vmem>>, vector<1x1x8x128xbf16>
    %101 = vector.shape_cast %100 : vector<1x1x8x128xbf16> to vector<8x128xbf16>
    %c0_66 = arith.constant 0 : index
    %c3_67 = arith.constant 3 : index
    %c0_68 = arith.constant 0 : index
    %c0_69 = arith.constant 0 : index
    %102 = vector.load %arg6[%c0_66, %c3_67, %c0_68, %c0_69] : memref<1x4x128x8xbf16, #tpu.memory_space<vmem>>, vector<1x1x128x8xbf16>
    %103 = vector.shape_cast %102 : vector<1x1x128x8xbf16> to vector<128x8xbf16>
    %104 = vector.extract_strided_slice %9 {offsets = [0, 24], sizes = [8, 8], strides = [1, 1]} : vector<8x32xbf16> to vector<8x8xbf16>
    %cst_70 = arith.constant dense<0.000000e+00> : vector<8x128xf32>
    %105 = tpu.matmul %104, %101, %cst_70 {dimension_numbers = #tpu.dot_dimension_numbers<[1], [0], [0], [1], [0, 0, 1, 1], [], []>} : vector<8x8xbf16>, vector<8x128xbf16>, vector<8x128xf32> -> vector<8x128xf32>
    %cst_71 = arith.constant 0.353553385 : f32
    %106 = vector.broadcast %cst_71 : f32 to vector<8x128xf32>
    %107 = arith.mulf %105, %106 : vector<8x128xf32>
    %108 = arith.addf %107, %1 : vector<8x128xf32>
    %cst_72 = arith.constant dense<0xFF800000> : vector<8xf32>
    %109 = vector.multi_reduction <maximumf>, %108, %cst_72 [1] : vector<8x128xf32> to vector<8xf32>
    %110 = vector.shape_cast %109 : vector<8xf32> to vector<8x1xf32>
    %cst_73 = arith.constant 0xFF800000 : f32
    %111 = vector.broadcast %cst_73 : f32 to vector<8x1xf32>
    %112 = arith.cmpf oeq, %110, %111 : vector<8x1xf32>
    %cst_74 = arith.constant 0.000000e+00 : f32
    %113 = vector.broadcast %cst_74 : f32 to vector<8x1xf32>
    %114 = arith.select %112, %113, %110 : vector<8x1xi1>, vector<8x1xf32>
    %115 = vector.broadcast %114 : vector<8x1xf32> to vector<8x128xf32>
    %116 = arith.subf %108, %115 : vector<8x128xf32>
    %117 = math.exp %116 : vector<8x128xf32>
    %cst_75 = arith.constant dense<0.000000e+00> : vector<8xf32>
    %118 = vector.multi_reduction <add>, %117, %cst_75 [1] : vector<8x128xf32> to vector<8xf32>
    %119 = vector.shape_cast %118 : vector<8xf32> to vector<8x1xf32>
    %cst_76 = arith.constant 0.000000e+00 : f32
    %120 = vector.broadcast %cst_76 : f32 to vector<8x1xf32>
    %121 = arith.cmpf ogt, %119, %120 : vector<8x1xf32>
    %122 = tpu.reciprocal %119 {approx = true} : vector<8x1xf32> -> vector<8x1xf32>
    %cst_77 = arith.constant 0.000000e+00 : f32
    %123 = vector.broadcast %cst_77 : f32 to vector<8x1xf32>
    %124 = arith.select %121, %122, %123 : vector<8x1xi1>, vector<8x1xf32>
    %125 = vector.broadcast %124 : vector<8x1xf32> to vector<8x128xf32>
    %126 = arith.mulf %117, %125 : vector<8x128xf32>
    %127 = arith.truncf %126 : vector<8x128xf32> to vector<8x128xbf16>
    %cst_78 = arith.constant dense<0.000000e+00> : vector<8x8xf32>
    %128 = tpu.matmul %127, %103, %cst_78 {dimension_numbers = #tpu.dot_dimension_numbers<[1], [0], [0], [1], [0, 0, 1, 1], [], []>} : vector<8x128xbf16>, vector<128x8xbf16>, vector<8x8xf32> -> vector<8x8xf32>
    %c0_79 = arith.constant 0 : index
    %c24 = arith.constant 24 : index
    %129 = vector.load %arg16[%c0_79, %c24] : memref<8x32xf32, #tpu.memory_space<vmem>>, vector<8x8xf32>
    tpu.vector_store %arg16[%c0_79, %c24], %128 {strides = array<i32>} : memref<8x32xf32, #tpu.memory_space<vmem>>, vector<8x8xf32>,
    %c0_80 = arith.constant 0 : index
    %c0_81 = arith.constant 0 : index
    %130 = vector.load %arg16[%c0_80, %c0_81] : memref<8x32xf32, #tpu.memory_space<vmem>>, vector<8x32xf32>
    %131 = arith.truncf %130 : vector<8x32xf32> to vector<8x32xbf16>
    %c0_82 = arith.constant 0 : index
    %c0_83 = arith.constant 0 : index
    %c0_84 = arith.constant 0 : index
    %132 = vector.load %arg9[%c0_82, %c0_83, %c0_84] : memref<1x32x32xbf16, #tpu.memory_space<vmem>>, vector<1x32x32xbf16>
    %133 = vector.shape_cast %132 : vector<1x32x32xbf16> to vector<32x32xbf16>
    %cst_85 = arith.constant dense<0.000000e+00> : vector<8x32xf32>
    %134 = tpu.matmul %131, %133, %cst_85 {dimension_numbers = #tpu.dot_dimension_numbers<[1], [0], [0], [1], [0, 0, 1, 1], [], []>} : vector<8x32xbf16>, vector<32x32xbf16>, vector<8x32xf32> -> vector<8x32xf32>
    %c0_86 = arith.constant 0 : index
    %c0_87 = arith.constant 0 : index
    %c0_88 = arith.constant 0 : index
    %135 = vector.load %arg10[%c0_86, %c0_87, %c0_88] : memref<1x1x32xf32, #tpu.memory_space<vmem>>, vector<1x1x32xf32>
    %136 = vector.shape_cast %135 : vector<1x1x32xf32> to vector<1x32xf32>
    %137 = vector.broadcast %136 : vector<1x32xf32> to vector<8x32xf32>
    %138 = arith.addf %134, %137 : vector<8x32xf32>
    %cst_89 = arith.constant 0.000000e+00 : f32
    %139 = vector.broadcast %cst_89 : f32 to vector<8x32xf32>
    %140 = arith.maximumf %138, %139 : vector<8x32xf32>
    %141 = arith.truncf %140 : vector<8x32xf32> to vector<8x32xbf16>
    %c0_90 = arith.constant 0 : index
    %c0_91 = arith.constant 0 : index
    %c0_92 = arith.constant 0 : index
    %142 = vector.load %arg11[%c0_90, %c0_91, %c0_92] : memref<1x32x32xbf16, #tpu.memory_space<vmem>>, vector<1x32x32xbf16>
    %143 = vector.shape_cast %142 : vector<1x32x32xbf16> to vector<32x32xbf16>
    %cst_93 = arith.constant dense<0.000000e+00> : vector<8x32xf32>
    %144 = tpu.matmul %141, %143, %cst_93 {dimension_numbers = #tpu.dot_dimension_numbers<[1], [0], [0], [1], [0, 0, 1, 1], [], []>} : vector<8x32xbf16>, vector<32x32xbf16>, vector<8x32xf32> -> vector<8x32xf32>
    %c0_94 = arith.constant 0 : index
    %c0_95 = arith.constant 0 : index
    %c0_96 = arith.constant 0 : index
    %145 = vector.load %arg12[%c0_94, %c0_95, %c0_96] : memref<1x1x32xf32, #tpu.memory_space<vmem>>, vector<1x1x32xf32>
    %146 = vector.shape_cast %145 : vector<1x1x32xf32> to vector<1x32xf32>
    %147 = vector.broadcast %146 : vector<1x32xf32> to vector<8x32xf32>
    %148 = arith.addf %144, %147 : vector<8x32xf32>
    %149 = arith.addf %148, %130 : vector<8x32xf32>
    %150 = arith.truncf %149 : vector<8x32xf32> to vector<8x32xbf16>
    %c0_97 = arith.constant 0 : index
    %c0_98 = arith.constant 0 : index
    %151 = vector.load %arg13[%c0_97, %c0_98] : memref<32x32xbf16, #tpu.memory_space<vmem>>, vector<32x32xbf16>
    %cst_99 = arith.constant dense<0.000000e+00> : vector<8x32xf32>
    %152 = tpu.matmul %150, %151, %cst_99 {dimension_numbers = #tpu.dot_dimension_numbers<[1], [0], [0], [1], [0, 0, 1, 1], [], []>} : vector<8x32xbf16>, vector<32x32xbf16>, vector<8x32xf32> -> vector<8x32xf32>
    %c0_100 = arith.constant 0 : index
    %c0_101 = arith.constant 0 : index
    %153 = vector.load %arg14[%c0_100, %c0_101] : memref<1x32xf32, #tpu.memory_space<vmem>>, vector<1x32xf32>
    %154 = vector.broadcast %153 : vector<1x32xf32> to vector<8x32xf32>
    %155 = arith.addf %152, %154 : vector<8x32xf32>
    %156 = arith.truncf %155 : vector<8x32xf32> to vector<8x32xbf16>
    %c0_102 = arith.constant 0 : index
    %c0_103 = arith.constant 0 : index
    %c0_104 = arith.constant 0 : index
    %157 = vector.load %arg7[%c0_102, %c0_103, %c0_104] : memref<1x32x128xbf16, #tpu.memory_space<vmem>>, vector<1x32x128xbf16>
    %158 = vector.shape_cast %157 : vector<1x32x128xbf16> to vector<32x128xbf16>
    %cst_105 = arith.constant dense<0.000000e+00> : vector<8x128xf32>
    %159 = tpu.matmul %156, %158, %cst_105 {dimension_numbers = #tpu.dot_dimension_numbers<[1], [0], [0], [1], [0, 0, 1, 1], [], []>} : vector<8x32xbf16>, vector<32x128xbf16>, vector<8x128xf32> -> vector<8x128xf32>
    %cst_106 = arith.constant 0.176776692 : f32
    %160 = vector.broadcast %cst_106 : f32 to vector<8x128xf32>
    %161 = arith.mulf %159, %160 : vector<8x128xf32>
    %162 = math.tanh %161 : vector<8x128xf32>
    %cst_107 = arith.constant 1.000000e+01 : f32
    %163 = vector.broadcast %cst_107 : f32 to vector<8x128xf32>
    %164 = arith.mulf %163, %162 : vector<8x128xf32>
    %165 = arith.addf %164, %1 : vector<8x128xf32>
    %cst_108 = arith.constant dense<0xFF800000> : vector<8xf32>
    %166 = vector.multi_reduction <maximumf>, %165, %cst_108 [1] : vector<8x128xf32> to vector<8xf32>
    %167 = vector.shape_cast %166 : vector<8xf32> to vector<8x1xf32>
    %cst_109 = arith.constant 0xFF800000 : f32
    %168 = vector.broadcast %cst_109 : f32 to vector<8x1xf32>
    %169 = arith.cmpf oeq, %167, %168 : vector<8x1xf32>
    %cst_110 = arith.constant 0.000000e+00 : f32
    %170 = vector.broadcast %cst_110 : f32 to vector<8x1xf32>
    %171 = arith.select %169, %170, %167 : vector<8x1xi1>, vector<8x1xf32>
    %172 = vector.broadcast %171 : vector<8x1xf32> to vector<8x128xf32>
    %173 = arith.subf %165, %172 : vector<8x128xf32>
    %174 = math.exp %173 : vector<8x128xf32>
    %cst_111 = arith.constant dense<0.000000e+00> : vector<8xf32>
    %175 = vector.multi_reduction <add>, %174, %cst_111 [1] : vector<8x128xf32> to vector<8xf32>
    %176 = vector.shape_cast %175 : vector<8xf32> to vector<8x1xf32>
    %cst_112 = arith.constant 0.000000e+00 : f32
    %177 = vector.broadcast %cst_112 : f32 to vector<8x1xf32>
    %178 = arith.cmpf ogt, %176, %177 : vector<8x1xf32>
    %179 = tpu.reciprocal %176 {approx = true} : vector<8x1xf32> -> vector<8x1xf32>
    %cst_113 = arith.constant 0.000000e+00 : f32
    %180 = vector.broadcast %cst_113 : f32 to vector<8x1xf32>
    %181 = arith.select %178, %179, %180 : vector<8x1xi1>, vector<8x1xf32>
    %182 = vector.broadcast %181 : vector<8x1xf32> to vector<8x128xf32>
    %183 = arith.mulf %174, %182 : vector<8x128xf32>
    %c0_114 = arith.constant 0 : index
    %c0_115 = arith.constant 0 : index
    %c0_116 = arith.constant 0 : index
    %184 = vector.load %arg15[%c0_114, %c0_115, %c0_116] : memref<1x8x128xf32, #tpu.memory_space<vmem>>, vector<1x8x128xf32>
    %185 = vector.shape_cast %184 : vector<1x8x128xf32> to vector<8x128xf32>
    %186 = vector.shape_cast %183 : vector<8x128xf32> to vector<1x8x128xf32>
    tpu.vector_store %arg15[%c0_114, %c0_115, %c0_116], %186 {strides = array<i32>} : memref<1x8x128xf32, #tpu.memory_space<vmem>>, vector<1x8x128xf32>,
    return
  }
  func.func @transform_0(%arg0: i32, %arg1: i32) -> (i32, i32, i32) {
    %c0_i32 = arith.constant 0 : i32
    %c0_i32_0 = arith.constant 0 : i32
    return %arg0, %arg1, %c0_i32 : i32, i32, i32
  }
  func.func @transform_1(%arg0: i32, %arg1: i32) -> (i32, i32, i32) {
    %c0_i32 = arith.constant 0 : i32
    %c0_i32_0 = arith.constant 0 : i32
    return %arg0, %arg1, %c0_i32 : i32, i32, i32
  }
  func.func @transform_2(%arg0: i32, %arg1: i32) -> (i32, i32, i32) {
    %c0_i32 = arith.constant 0 : i32
    %c0_i32_0 = arith.constant 0 : i32
    return %arg0, %arg1, %c0_i32 : i32, i32, i32
  }
  func.func @transform_3(%arg0: i32, %arg1: i32) -> (i32, i32, i32, i32) {
    %c0_i32 = arith.constant 0 : i32
    %c0_i32_0 = arith.constant 0 : i32
    %c0_i32_1 = arith.constant 0 : i32
    %c0_i32_2 = arith.constant 0 : i32
    return %arg0, %c0_i32, %c0_i32_0, %c0_i32_1 : i32, i32, i32, i32
  }
  func.func @transform_4(%arg0: i32, %arg1: i32) -> (i32, i32, i32, i32) {
    %c0_i32 = arith.constant 0 : i32
    %c0_i32_0 = arith.constant 0 : i32
    %c0_i32_1 = arith.constant 0 : i32
    %c0_i32_2 = arith.constant 0 : i32
    return %arg0, %c0_i32, %c0_i32_0, %c0_i32_1 : i32, i32, i32, i32
  }
  func.func @transform_5(%arg0: i32, %arg1: i32) -> (i32, i32, i32) {
    %c0_i32 = arith.constant 0 : i32
    %c0_i32_0 = arith.constant 0 : i32
    %c0_i32_1 = arith.constant 0 : i32
    return %arg0, %c0_i32, %c0_i32_0 : i32, i32, i32
  }
  func.func @transform_6(%arg0: i32, %arg1: i32) -> (i32, i32) {
    %c0_i32 = arith.constant 0 : i32
    %c0_i32_0 = arith.constant 0 : i32
    %c0_i32_1 = arith.constant 0 : i32
    return %c0_i32, %c0_i32_0 : i32, i32
  }
  func.func @transform_7(%arg0: i32, %arg1: i32) -> (i32, i32, i32) {
    %c0_i32 = arith.constant 0 : i32
    %c0_i32_0 = arith.constant 0 : i32
    %c0_i32_1 = arith.constant 0 : i32
    return %arg0, %c0_i32, %c0_i32_0 : i32, i32, i32
  }
  func.func @transform_8(%arg0: i32, %arg1: i32) -> (i32, i32, i32) {
    %c0_i32 = arith.constant 0 : i32
    %c0_i32_0 = arith.constant 0 : i32
    %c0_i32_1 = arith.constant 0 : i32
    return %arg0, %c0_i32, %c0_i32_0 : i32, i32, i32
  }
  func.func @transform_9(%arg0: i32, %arg1: i32) -> (i32, i32, i32) {
    %c0_i32 = arith.constant 0 : i32
    %c0_i32_0 = arith.constant 0 : i32
    %c0_i32_1 = arith.constant 0 : i32
    return %arg0, %c0_i32, %c0_i32_0 : i32, i32, i32
  }
  func.func @transform_10(%arg0: i32, %arg1: i32) -> (i32, i32, i32) {
    %c0_i32 = arith.constant 0 : i32
    %c0_i32_0 = arith.constant 0 : i32
    %c0_i32_1 = arith.constant 0 : i32
    return %arg0, %c0_i32, %c0_i32_0 : i32, i32, i32
  }
  func.func @transform_11(%arg0: i32, %arg1: i32) -> (i32, i32) {
    %c0_i32 = arith.constant 0 : i32
    %c0_i32_0 = arith.constant 0 : i32
    %c0_i32_1 = arith.constant 0 : i32
    return %c0_i32, %c0_i32_0 : i32, i32
  }
  func.func @transform_12(%arg0: i32, %arg1: i32) -> (i32, i32) {
    %c0_i32 = arith.constant 0 : i32
    %c0_i32_0 = arith.constant 0 : i32
    %c0_i32_1 = arith.constant 0 : i32
    return %c0_i32, %c0_i32_0 : i32, i32
  }
  func.func @transform_13(%arg0: i32, %arg1: i32) -> (i32, i32, i32) {
    %c0_i32 = arith.constant 0 : i32
    %c0_i32_0 = arith.constant 0 : i32
    return %arg0, %arg1, %c0_i32 : i32, i32, i32
  }
}

</mosaic_0001>

<bundles_post_ra>
// kernel: tpu_custom_call.1
= control target key start
LH: loop header
LB: loop body
LE: loop exit
PB: predicated region body
PF: predicated region fallthrough
CT: control target
= control target key end

     0   :  { %s2821_s0 = inlined_call_operand.vmem [shape: bf16[2,8,32], index: 0, kind: input, shape index: {}]   ;;  %s2822_s1 = inlined_call_operand.vmem [shape: f32[2,8,128], index: 1, kind: input, shape index: {}]   ;;  %s2823_s2 = inlined_call_operand.vmem [shape: f32[2,8,32], index: 2, kind: input, shape index: {}]   ;;  %s2824_s3 = inlined_call_operand.vmem [shape: bf16[2,4,8,128], index: 3, kind: input, shape index: {}]   ;;  %s2825_s4 = inlined_call_operand.vmem [shape: bf16[2,4,128,8], index: 4, kind: input, shape index: {}]   ;;  %s2826_s5 = inlined_call_operand.vmem [shape: bf16[2,32,128], index: 5, kind: input, shape index: {}]   ;;  %s2827_s6 = inlined_call_operand.vmem [shape: bf16[32,32], index: 6, kind: input, shape index: {}]   ;;  %s2828_s7 = inlined_call_operand.vmem [shape: bf16[2,32,32], index: 7, kind: input, shape index: {}]   ;;  %s2829_s8 = inlined_call_operand.vmem [shape: f32[2,1,32], index: 8, kind: input, shape index: {}]   ;;  %s2830_s9 = inlined_call_operand.vmem [shape: bf16[2,32,32], index: 9, kind: input, shape index: {}]   ;;  %s2831_s10 = inlined_call_operand.vmem [shape: f32[2,1,32], index: 10, kind: input, shape index: {}]   ;;  %s2832_s11 = inlined_call_operand.vmem [shape: bf16[32,32], index: 11, kind: input, shape index: {}]   ;;  %s2833_s12 = inlined_call_operand.vmem [shape: f32[1,32], index: 12, kind: input, shape index: {}]   ;;  %s2834_s13 = inlined_call_operand.hbm [shape: f32[2,8,128], index: 13, kind: output, shape index: {}]  }
   0x1   :  { %2837 = sst [smem:[#allocation9_spill]] %s2827_s6 }
   0x2   :  { %18 = vsyncpa [#allocation4], 0 }
   0x3   :  { %20 = vsyncpa [#allocation4 + $0x1], 0  ;;  %s2511_s25 = smov 0   ;;  %s2513_s26 = smov 0  }
   0x4   :  { %s2515_s27 = smov 0   ;;  %s2517_s28 = smov 0  }
   0x5   :  { %s2519_s29 = smov 0   ;;  %s2521_s30 = smov 0  }
   0x6 LB: > { %2838 = sst [smem:[#allocation6_spill]] %s2426_s29  ;;  %s1889_s14 = sadd.s32 4294967295, %s2430_s30   ;;  %s2430_s30 = sphi %s2521_s30, %s26_s30   ;;  %s2426_s29 = sphi %s2519_s29, %s2846_s29   ;;  %s2422_s28 = sphi %s2517_s28, %s2845_s28   ;;  %s2418_s27 = sphi %s2515_s27, %s2849_s27   ;;  %s2414_s26 = sphi %s2513_s26, %s2848_s26   ;;  %s2410_s25 = sphi %s2511_s25, %s2847_s25  }
   0x7   : > { %s1890_s15 = sadd.s32 4294967294, %s2430_s30   ;;  %s38_s16 = sadd.s32 1, %s2426_s29 }
   0x8   : > { %s376_s17 = sadd.s32 1, %s2418_s27  ;;  %p40_p0 = scmp.ge.s32.totalorder %s38_s16, 2 }
   0x9   : > { %p386_p1 = scmp.ne.s32.totalorder %s2418_s27, %s2414_s26  ;;  %p387_p2 = scmp.eq.s32.totalorder %s1889_s14, 1 }
   0xa   : > { %p392_p3 = scmp.ne.s32.totalorder %s2414_s26, %s2410_s25  ;;  %s2851_s16 = smov (%p40_p0, %s38_s16), 0 }
   0xb   : > { %2839 = sst [smem:[#allocation7_spill]] %s2851_s16  ;;  %p2551_p4 = por %p387_p2, %p386_p1 }
   0xc   : > { %p393_p5 = scmp.eq.s32.totalorder %s1890_s15, 1  ;;  %s371_s19 = ssub.s32 %s2426_s29, %s2851_s16 }
   0xd   : > { %p1893_p6 = scmp.ge.s32.totalorder %s2430_s30, 1  ;;  %p374_p7 = scmp.eq.s32.totalorder %s371_s19, 0 }
   0xe   : > { %p2558_p8 = por %p393_p5, %p392_p3  ;;  %p502_p9 = scmp.lt.s32.totalorder %s2430_s30, 3 }
   0xf   : > { %s2564_s21 = scalar_select %p374_p7, %s2418_s27, %s376_s17  }
  0x10   : > { %p503_p10 = pnand %p1893_p6, %p502_p9 }
  0x11   : > { %2842 = sst [smem:[#allocation8_spill]] %s2564_s21  ;;  %s2843_s6 = sld [smem:[#allocation9_spill]] (!%p503_p10)  ;;  %v2432_v1 = vmov (!%p503_p10), 0.0   ;;  %vm2433_vm0 = vmmov (!%p503_p10), 0   ;;  %vm664_vm1 = vcmask (!%p503_p10), 261120   ;;  %vm732_vm2 = vcmask (!%p503_p10), 1043456  }
  0x12   : > { %506 = sbr.rel (%p503_p10) target bundleno = 2983 (0xba7), region = 72  ;;  %2081 = vmatprep.subr.bf16.mxu0 (!%p503_p10), %v2432_v1  ;;  %2089 = vmatprep.subr.bf16.mxu1 (!%p503_p10), %v2432_v1  ;;  %p593_p11 = scmp.lt.s32.totalorder (!%p503_p10), %s2422_s28, 1  ;;  %vm728_vm3 = vcmask (!%p503_p10), 64512   ;;  %vm1057_vm11 = vcmask (!%p503_p10), 130112   ;;  %vm1234_vm13 = vcmask (!%p503_p10), 195712   ;;  %vm1411_vm14 = vcmask (!%p503_p10), 261312  }
  0x13   : > { %2085 = vmatprep.mubr.msk.bf16.mxu0 (!%p503_p10), %vm2433_vm0, %v2432_v1  ;;  %2091 = vmatprep.mubr.msk.bf16.mxu1 (!%p503_p10), %vm2433_vm0, %v2432_v1  ;;  %s2436_s21 = smov (!%p503_p10), 104  }
  0x17   : > { %v2288_v0 = vld [vmem:[%s2843_s6] sm:$0xff] (!%p503_p10)   ;;  %v2289_v2 = vld [vmem:[%s2843_s6 + $0x8] sm:$0xff] (!%p503_p10)  }
  0x18   : > { %2082 = vmatpush3.bf16.msra.mxu0 (!%p503_p10), %v2288_v0 }
  0x19   : > { %2083 = vmatprep.subr.bf16.mxu0 %v2432_v1  ;;  %s2581_s15 = scalar_select %p593_p11, %s2422_s28, 1 }
  0x1b   : > { %s1895_s17 = sshll.u32 %s2581_s15, 2  ;;  %s2018_s19 = sshll.u32 %s2581_s15, 8 }
  0x1c   : > { %2084 = vmatpush3.bf16.msra.mxu0 %v2289_v2  ;;  %s599_s24 = scalar_lea.vmem %s2821_s0, %s1895_s17  ;;  %s2591_s16 = scalar_lea.vmem %s2825_s4, %s2018_s19 }
  0x1d   : > { %2115 = vmatprep.subr.bf16.mxu0 %v2432_v1  ;;  %v647_v3 = vld [vmem:[%s599_s24] sm:$0xf]  ;;  %s2598_s29 = sshll.u32 %s2581_s15, 4  ;;  %s1896_s6 = sshll.u32 %s2581_s15, 3  ;;  %v2291_v34 = vld [vmem:[%s2591_s16 + $0x8] sm:$0xff]   ;;  %v2292_v36 = vld [vmem:[%s2591_s16 + $0x10] sm:$0xff]  }
  0x1e   : > { %s2604_s17 = scalar_lea.vmem %s2824_s3, %s2598_s29  ;;  %s613_s23 = scalar_lea.vmem %s2823_s2, %s1896_s6  ;;  %v2290_v33 = vld [vmem:[%s2591_s16] sm:$0xff]   ;;  %v2293_v37 = vld [vmem:[%s2591_s16 + $0x18] sm:$0xff]   ;;  %v2295_v39 = vld [vmem:[%s2591_s16 + $0x28] sm:$0xff]  }
  0x1f   : > { %2086 = vmatmul.mubr.msk.bf16.vlgmr.msra.gmra.mrb[0].mxu0 %vm664_vm1, %v647_v3  ;;  %v711_v4 = vld [vmem:[%s2604_s17] sm:$0xf]  ;;  %v1920_v6 = vld [vmem:[%s2604_s17 + $0x4] sm:$0xf]  ;;  %s2434_s24 = smov 120   ;;  %s606_s19 = scalar_lea.vmem %s2822_s1, %s1896_s6  ;;  %v2296_v40 = vld [vmem:[%s2591_s16 + $0x30] sm:$0xff]  }
  0x20   : > { %2117 = vmatprep.mubr.msk.bf16.mxu0 %vm2433_vm0, %v2432_v1  ;;  %v734_v5 = vsel %vm732_vm2, %v711_v4, 0  ;;  %v907_v7 = vsel %vm732_vm2, %v1920_v6, 0  ;;  %v708_v8 = vld [vmem:[%s613_s23] sm:$0xff]  ;;  %v2297_v41 = vld [vmem:[%s2591_s16 + $0x38] sm:$0xff]   ;;  %v2299_v43 = vld [vmem:[%s2591_s16 + $0x48] sm:$0xff]   ;;  %s2435_s6 = smov 112   ;;  %s633_s14 = scalar_lea.vmem %s2828_s7, %s2598_s29 }
  0x21   : > { %2090 = vmatpush3.bf16.msra.mxu1 %v734_v5  ;;  %2116 = vmatpush3.bf16.msra.mxu0 %v907_v7  ;;  %v2629_v16 = vld [vmem:[%s606_s19] sm:$0xff]  ;;  %v2300_v44 = vld [vmem:[%s2591_s16 + $0x50] sm:$0xff]   ;;  %v2301_v45 = vld [vmem:[%s2591_s16 + $0x58] sm:$0xff]   ;;  %s2014_s19 = sshll.u32 %s2422_s28, 7  ;;  %s2440_s28 = smov [#allocation3]  }
  0x22   : > { %2095 = vmatprep.subr.bf16.mxu1 %v2432_v1  ;;  %2121 = vmatprep.subr.bf16.mxu0 %v2432_v1  ;;  %v2294_v38 = vld [vmem:[%s2591_s16 + $0x20] sm:$0xff]   ;;  %v2303_v52 = vld [vmem:[%s2591_s16 + $0x68] sm:$0xff]   ;;  %v2304_v53 = vld [vmem:[%s2591_s16 + $0x70] sm:$0xff]   ;;  %s2774_s23 = scalar_lea.hbm %s2834_s13, %s2014_s19 }
  0x23   : > { %v2298_v42 = vld [vmem:[%s2591_s16 + $0x40] sm:$0xff]   ;;  %v2305_v54 = vld [vmem:[%s2591_s16 + $0x78] sm:$0xff]   ;;  %v1946_v58 = vld [vmem:[%s2604_s17 + $0x8] sm:$0xf] }
  0x24   : > { %v2302_v51 = vld [vmem:[%s2591_s16 + $0x60] sm:$0xff]   ;;  %v1084_v61 = vsel %vm732_vm2, %v1946_v58, 0  ;;  %v1972_v3 = vld [vmem:[%s2604_s17 + $0xc] sm:$0xf]  ;;  %s2437_s17 = smov 8  }
  0x25   : > { %v1261_v6 = vsel %vm732_vm2, %v1972_v3, 0 }
  0xf2   : > { %v702_v9 = vpop.f32.mrb[0].mxu0 }
  0xf3   : > { %v709_v10 = vadd.f32 %v708_v8, %v702_v9  ;;  %v2087_v11 = vpop.f32.mrb[1].mxu0 }
  0xf4   : > { %v705_v12 = vpop.f32.mrb[2].mxu0 }
  0xf5   : > { %v2616_v13 = vpack.c.bf16 %v709_v10, %v709_v10  ;;  %v2088_v14 = vpop.f32.mrb[3].mxu0 }
  0xf7   : > { %901 = vrot.lane.b32.xlu0 %v2616_v13, %s2434_s24  ;;  %2092 = vmatmul.mubr.msk.bf16.vlgmr.msra.gmra.mrb[0].mxu1 %vm728_vm3, %v2616_v13  ;;  %s644_s24 = scalar_lea.vmem %s2831_s10, %s2581_s15 }
  0xf8   : > { %2111 = vmatprep.mubr.msk.bf16.mxu1 %vm2433_vm0, %v2432_v1  ;;  %2096 = vmatpush3.bf16.msra.mxu1 %v2290_v33 }
  0xf9   : > { %2097 = vmatprep.subr.bf16.mxu1 %v2432_v1 }
  0xfc   : > { %2098 = vmatpush3.bf16.msra.mxu1 %v2291_v34 }
  0xfd   : > { %2099 = vmatprep.subr.bf16.mxu1 %v2432_v1 }
 0x100   : > { %2100 = vmatpush3.bf16.msra.mxu1 %v2292_v36 }
 0x101   : > { %2101 = vmatprep.subr.bf16.mxu1 %v2432_v1 }
 0x104   : > { %2102 = vmatpush3.bf16.msra.mxu1 %v2293_v37 }
 0x105   : > { %2103 = vmatprep.subr.bf16.mxu1 %v2432_v1 }
 0x108   : > { %2104 = vmatpush3.bf16.msra.mxu1 %v2294_v38 }
 0x109   : > { %2105 = vmatprep.subr.bf16.mxu1 %v2432_v1 }
 0x10c   : > { %2106 = vmatpush3.bf16.msra.mxu1 %v2295_v39 }
 0x10d   : > { %2107 = vmatprep.subr.bf16.mxu1 %v2432_v1 }
 0x110   : > { %2108 = vmatpush3.bf16.msra.mxu1 %v2296_v40 }
 0x111   : > { %2109 = vmatprep.subr.bf16.mxu1 %v2432_v1 }
 0x114   : > { %2110 = vmatpush3.bf16.msra.mxu1 %v2297_v41 }
 0x115   : > { %2141 = vmatprep.subr.bf16.mxu1 %v2432_v1 }
 0x169   : > { %v902_v15 = vpop.permute.xlu0 %901 }
 0x16a   : > { %2118 = vmatmul.mubr.msk.bf16.vlgmr.msra.gmra.mrb[4].mxu0 %vm728_vm3, %v902_v15 }
 0x16b   : > { %2137 = vmatprep.mubr.msk.bf16.mxu0 %vm2433_vm0, %v2432_v1  ;;  %2122 = vmatpush3.bf16.msra.mxu0 %v2298_v42  ;;  %v2310_v42 = vld [vmem:[%s2591_s16 + $0xa0] sm:$0xff]  }
 0x16c   : > { %2123 = vmatprep.subr.bf16.mxu0 %v2432_v1 }
 0x16f   : > { %2124 = vmatpush3.bf16.msra.mxu0 %v2299_v43  ;;  %v2311_v43 = vld [vmem:[%s2591_s16 + $0xa8] sm:$0xff]  }
 0x170   : > { %2125 = vmatprep.subr.bf16.mxu0 %v2432_v1 }
 0x173   : > { %2126 = vmatpush3.bf16.msra.mxu0 %v2300_v44  ;;  %v2312_v44 = vld [vmem:[%s2591_s16 + $0xc0] sm:$0xff]  }
 0x174   : > { %2127 = vmatprep.subr.bf16.mxu0 %v2432_v1 }
 0x177   : > { %2128 = vmatpush3.bf16.msra.mxu0 %v2301_v45 }
 0x178   : > { %2129 = vmatprep.subr.bf16.mxu0 %v2432_v1 }
 0x17b   : > { %2130 = vmatpush3.bf16.msra.mxu0 %v2302_v51  ;;  %v2318_v51 = vld [vmem:[%s2591_s16 + $0xe0] sm:$0xff]  }
 0x17c   : > { %2131 = vmatprep.subr.bf16.mxu0 %v2432_v1 }
 0x17f   : > { %2132 = vmatpush3.bf16.msra.mxu0 %v2303_v52  ;;  %v2319_v52 = vld [vmem:[%s2591_s16 + $0xe8] sm:$0xff]  }
 0x180   : > { %2133 = vmatprep.subr.bf16.mxu0 %v2432_v1 }
 0x183   : > { %2134 = vmatpush3.bf16.msra.mxu0 %v2304_v53  ;;  %v2320_v53 = vld [vmem:[%s2591_s16 + $0xf0] sm:$0xff]  }
 0x184   : > { %2135 = vmatprep.subr.bf16.mxu0 %v2432_v1 }
 0x187   : > { %2136 = vmatpush3.bf16.msra.mxu0 %v2305_v54  ;;  %v2321_v54 = vld [vmem:[%s2591_s16 + $0xf8] sm:$0xff]  }
 0x188   : > { %2167 = vmatprep.subr.bf16.mxu0 %v2432_v1 }
 0x1ca   : > { %v770_v17 = vpop.f32.mrb[0].mxu1 }
 0x1cb   : > { %v776_v18 = vmul.f32 0.35355338, %v770_v17  ;;  %v2093_v19 = vpop.f32.mrb[1].mxu1 }
 0x1cc   : > { %v773_v20 = vpop.f32.mrb[2].mxu1 }
 0x1cd   : > { %v2094_v21 = vpop.f32.mrb[3].mxu1  ;;  %v777_v22 = vadd.f32 %v776_v18, %v2629_v16 }
 0x1cf   : > { %778 = vmax.xlane.f32.xlu0 %v777_v22 }
 0x23d   : > { %v943_v23 = vpop.f32.mrb[4].mxu0 }
 0x23e   : > { %v949_v24 = vmul.f32 0.35355338, %v943_v23  ;;  %v2119_v25 = vpop.f32.mrb[5].mxu0 }
 0x23f   : > { %v946_v26 = vpop.f32.mrb[6].mxu0 }
 0x240   : > { %v2120_v27 = vpop.f32.mrb[7].mxu0  ;;  %v950_v28 = vadd.f32 %v949_v24, %v2629_v16 }
 0x242   : > { %951 = vmax.xlane.f32.xlu1 %v950_v28 }
 0x25c   : > { %v779_v29 = vpop.xlane.xlu0 %778 }
 0x25d   : > { %vm780_vm4 = vcmp.eq.f32.partialorder %v779_v29, -inf }
 0x25e   : > { %v781_v30 = vsel %vm780_vm4, 0.0, %v779_v29  ;;  %v2306_v29 = vld [vmem:[%s2591_s16 + $0x80] sm:$0xff]  }
 0x25f   : > { %v782_v31 = vsub.f32 %v777_v22, %v781_v30  ;;  %v2307_v30 = vld [vmem:[%s2591_s16 + $0x88] sm:$0xff]  }
 0x261   : > { %v783_v32 = vmul.f32 1.442695, %v782_v31  ;;  %v2308_v31 = vld [vmem:[%s2591_s16 + $0x90] sm:$0xff]  }
 0x263   : > { %2330 = vpow2.f32 %v783_v32  ;;  %v2309_v32 = vld [vmem:[%s2591_s16 + $0x98] sm:$0xff]  }
 0x26d   : > { %v2331_v35 = vpop.eup %2330 }
 0x26e   : > { %785 = vadd.xlane.f32.xlu1 %v2331_v35 }
 0x2cf   : > { %v952_v46 = vpop.xlane.xlu1 %951 }
 0x2d0   : > { %vm953_vm5 = vcmp.eq.f32.partialorder %v952_v46, -inf }
 0x2d1   : > { %v954_v47 = vsel %vm953_vm5, 0.0, %v952_v46  ;;  %v2313_v46 = vld [vmem:[%s2591_s16 + $0xb0] sm:$0xff]  }
 0x2d2   : > { %v955_v48 = vsub.f32 %v950_v28, %v954_v47  ;;  %v2314_v47 = vld [vmem:[%s2591_s16 + $0xc8] sm:$0xff]  }
 0x2d4   : > { %v956_v49 = vmul.f32 1.442695, %v955_v48  ;;  %v2315_v48 = vld [vmem:[%s2591_s16 + $0xb8] sm:$0xff]  }
 0x2d6   : > { %2332 = vpow2.f32 %v956_v49  ;;  %v2316_v49 = vld [vmem:[%s2591_s16 + $0xd0] sm:$0xff]  }
 0x2e0   : > { %v2333_v50 = vpop.eup %2332 }
 0x2e1   : > { %958 = vadd.xlane.f32.xlu1 %v2333_v50 }
 0x2f2   : > { %1078 = vrot.lane.b32.xlu1 %v2616_v13, %s2435_s6  ;;  %s641_s6 = scalar_lea.vmem %s2830_s9, %s2598_s29 }
 0x2f6   : > { %1255 = vrot.lane.b32.xlu1 %v2616_v13, %s2436_s21  ;;  %s2439_s21 = smov 24  }
 0x2fb   : > { %v786_v55 = vpop.xlane.xlu1 %785 }
 0x2fc   : > { %2334 = vrcp.f32 %v786_v55  ;;  %vm787_vm6 = vcmp.gt.f32.partialorder %v786_v55, 0.0 }
 0x306   : > { %v2335_v56 = vpop.eup %2334 }
 0x307   : > { %v789_v57 = vsel %vm787_vm6, %v2335_v56, 0.0 }
 0x308   : > { %v790_v59 = vmul.f32 %v2331_v35, %v789_v57 }
 0x30a   : > { %v791_v60 = vpack.c.bf16 %v790_v59, %v790_v59 }
 0x30c   : > { %2112 = vmatmul.mubr.bf16.vlgmr.msra.gmra.mrb[4].mxu1 %v791_v60 }
 0x30d   : > { %2142 = vmatpush3.bf16.msra.mxu1 %v1084_v61  ;;  %2143 = vmatprep.mubr.msk.bf16.mxu1 %vm2433_vm0, %v2432_v1 }
 0x30e   : > { %2147 = vmatprep.subr.bf16.mxu1 %v2432_v1 }
 0x36e   : > { %v959_v62 = vpop.xlane.xlu1 %958 }
 0x36f   : > { %2336 = vrcp.f32 %v959_v62  ;;  %vm960_vm7 = vcmp.gt.f32.partialorder %v959_v62, 0.0 }
 0x372   : > { %v1079_v63 = vpop.permute.xlu1 %1078 }
 0x373   : > { %2144 = vmatmul.mubr.msk.bf16.vlgmr.msra.gmra.mrb[8].mxu1 %vm728_vm3, %v1079_v63 }
 0x374   : > { %2163 = vmatprep.mubr.msk.bf16.mxu1 %vm2433_vm0, %v2432_v1  ;;  %2148 = vmatpush3.bf16.msra.mxu1 %v2306_v29  ;;  %v2327_v29 = vld [vmem:[%s2832_s11 + $0x8] sm:$0xff]  }
 0x375   : > { %2149 = vmatprep.subr.bf16.mxu1 %v2432_v1 }
 0x376   : > { %v1256_v7 = vpop.permute.xlu1 %1255 }
 0x378   : > { %2150 = vmatpush3.bf16.msra.mxu1 %v2307_v30 }
 0x379   : > { %v2337_v0 = vpop.eup %2336  ;;  %2151 = vmatprep.subr.bf16.mxu1 %v2432_v1 }
 0x37a   : > { %v962_v2 = vsel %vm960_vm7, %v2337_v0, 0.0 }
 0x37b   : > { %v963_v4 = vmul.f32 %v2333_v50, %v962_v2  ;;  %v2317_v50 = vld [vmem:[%s2591_s16 + $0xd8] sm:$0xff]   ;;  %s2438_s16 = smov 16  }
 0x37c   : > { %2152 = vmatpush3.bf16.msra.mxu1 %v2308_v31  ;;  %v2002_v31 = vld [vmem:[%s644_s24] ss:$0 sm:$0xff] }
 0x37d   : > { %v964_v5 = vpack.c.bf16 %v963_v4, %v963_v4  ;;  %2153 = vmatprep.subr.bf16.mxu1 %v2432_v1 }
 0x37f   : > { %2138 = vmatmul.mubr.bf16.vlgmr.msra.gmra.mrb[8].mxu0 %v964_v5 }
 0x380   : > { %2168 = vmatpush3.bf16.msra.mxu0 %v1261_v6  ;;  %2169 = vmatprep.mubr.msk.bf16.mxu0 %vm2433_vm0, %v2432_v1 }
 0x381   : > { %2173 = vmatprep.subr.bf16.mxu0 %v2432_v1  ;;  %2154 = vmatpush3.bf16.msra.mxu1 %v2309_v32 }
 0x382   : > { %2155 = vmatprep.subr.bf16.mxu1 %v2432_v1 }
 0x385   : > { %2156 = vmatpush3.bf16.msra.mxu1 %v2310_v42 }
 0x386   : > { %2157 = vmatprep.subr.bf16.mxu1 %v2432_v1 }
 0x387   : > { %2170 = vmatmul.mubr.msk.bf16.vlgmr.msra.gmra.mrb[12].mxu0 %vm728_vm3, %v1256_v7  ;;  %v2322_v7 = vld [vmem:[%s633_s14] sm:$0xff]  }
 0x388   : > { %2189 = vmatprep.mubr.msk.bf16.mxu0 %vm2433_vm0, %v2432_v1  ;;  %2174 = vmatpush3.bf16.msra.mxu0 %v2312_v44 }
 0x389   : > { %2158 = vmatpush3.bf16.msra.mxu1 %v2311_v43  ;;  %2175 = vmatprep.subr.bf16.mxu0 %v2432_v1 }
 0x38a   : > { %2159 = vmatprep.subr.bf16.mxu1 %v2432_v1 }
 0x38c   : > { %2176 = vmatpush3.bf16.msra.mxu0 %v2314_v47 }
 0x38d   : > { %2160 = vmatpush3.bf16.msra.mxu1 %v2313_v46  ;;  %2177 = vmatprep.subr.bf16.mxu0 %v2432_v1 }
 0x38e   : > { %2161 = vmatprep.subr.bf16.mxu1 %v2432_v1 }
 0x390   : > { %2178 = vmatpush3.bf16.msra.mxu0 %v2316_v49 }
 0x391   : > { %2162 = vmatpush3.bf16.msra.mxu1 %v2315_v48  ;;  %2179 = vmatprep.subr.bf16.mxu0 %v2432_v1 }
 0x392   : > { %2193 = vmatprep.subr.bf16.mxu1 %v2432_v1 }
 0x394   : > { %2180 = vmatpush3.bf16.msra.mxu0 %v2317_v50 }
 0x395   : > { %2181 = vmatprep.subr.bf16.mxu0 %v2432_v1 }
 0x398   : > { %2182 = vmatpush3.bf16.msra.mxu0 %v2318_v51 }
 0x399   : > { %2183 = vmatprep.subr.bf16.mxu0 %v2432_v1 }
 0x39c   : > { %2184 = vmatpush3.bf16.msra.mxu0 %v2319_v52 }
 0x39d   : > { %2185 = vmatprep.subr.bf16.mxu0 %v2432_v1 }
 0x3a0   : > { %2186 = vmatpush3.bf16.msra.mxu0 %v2320_v53 }
 0x3a1   : > { %2187 = vmatprep.subr.bf16.mxu0 %v2432_v1 }
 0x3a4   : > { %2188 = vmatpush3.bf16.msra.mxu0 %v2321_v54 }
 0x3a5   : > { %2209 = vmatprep.subr.bf16.mxu0 %v2432_v1 }
 0x3df   : > { %v874_v8 = vpop.f32.mrb[4].mxu1 }
 0x3e0   : > { %880 = vst.msk [vmem:[#allocation2] sm:$0xff] %vm728_vm3, %v874_v8  ;;  %v2113_v9 = vpop.f32.mrb[5].mxu1  ;;  %v2323_v8 = vld [vmem:[%s633_s14 + $0x8] sm:$0xff]   ;;  %s636_s14 = scalar_lea.vmem %s2829_s8, %s2581_s15  ;;  %s590_s15 = sand.u32 1, %s2414_s26  }
 0x3e1   : > { %v877_v10 = vpop.f32.mrb[6].mxu1  ;;  %s1894_s22 = sshll.u32 %s590_s15, 3  ;;  %s1696_s24 = scalar_lea.sflag [#allocation4], %s590_s15 }
 0x3e2   : > { %v2114_v11 = vpop.f32.mrb[7].mxu1 }
 0x446   : > { %v1120_v12 = vpop.f32.mrb[8].mxu1 }
 0x447   : > { %v1126_v13 = vmul.f32 0.35355338, %v1120_v12  ;;  %v2145_v14 = vpop.f32.mrb[9].mxu1 }
 0x448   : > { %v1123_v15 = vpop.f32.mrb[10].mxu1 }
 0x449   : > { %v2146_v17 = vpop.f32.mrb[11].mxu1  ;;  %v1127_v18 = vadd.f32 %v1126_v13, %v2629_v16 }
 0x44a   : > { %v2324_v17 = vld [vmem:[%s641_s6] sm:$0xff]  }
 0x44b   : > { %1128 = vmax.xlane.f32.xlu1 %v1127_v18 }
 0x452   : > { %v2685_v19 = vpop.f32.mrb[8].mxu0 }
 0x453   : > { %v2139_v20 = vpop.f32.mrb[9].mxu0 }
 0x454   : > { %v1050_v21 = vpop.f32.mrb[10].mxu0  ;;  %v2326_v20 = vld [vmem:[%s2832_s11] sm:$0xff]  }
 0x455   : > { %v2140_v22 = vpop.f32.mrb[11].mxu0  ;;  %v1998_v21 = vld [vmem:[%s636_s14] ss:$0 sm:$0xff]  ;;  %s2356_s14 = sshll.u32 %s2440_s28, 4  ;;  %s2357_s14 = int_to_ptr.vmem [resolvable:$false] %s2356_s14 }
 0x45a   : > { %v1297_v23 = vpop.f32.mrb[12].mxu0 }
 0x45b   : > { %v1303_v24 = vmul.f32 0.35355338, %v1297_v23  ;;  %v2171_v25 = vpop.f32.mrb[13].mxu0 }
 0x45c   : > { %v1300_v26 = vpop.f32.mrb[14].mxu0 }
 0x45d   : > { %v2172_v27 = vpop.f32.mrb[15].mxu0  ;;  %v1304_v28 = vadd.f32 %v1303_v24, %v2629_v16 }
 0x45f   : > { %1305 = vmax.xlane.f32.xlu0 %v1304_v28 }
 0x4d8   : > { %v1129_v33 = vpop.xlane.xlu1 %1128 }
 0x4d9   : > { %vm1130_vm8 = vcmp.eq.f32.partialorder %v1129_v33, -inf }
 0x4da   : > { %v1131_v34 = vsel %vm1130_vm8, 0.0, %v1129_v33 }
 0x4db   : > { %v1132_v35 = vsub.f32 %v1127_v18, %v1131_v34 }
 0x4dd   : > { %v1133_v36 = vmul.f32 1.442695, %v1132_v35 }
 0x4df   : > { %2338 = vpow2.f32 %v1133_v36 }
 0x4e9   : > { %v2339_v37 = vpop.eup %2338 }
 0x4ea   : > { %1135 = vadd.xlane.f32.xlu0 %v2339_v37 }
 0x4ec   : > { %v1306_v38 = vpop.xlane.xlu0 %1305 }
 0x4ed   : > { %vm1307_vm9 = vcmp.eq.f32.partialorder %v1306_v38, -inf }
 0x4ee   : > { %v1308_v39 = vsel %vm1307_vm9, 0.0, %v1306_v38 }
 0x4ef   : > { %v1309_v40 = vsub.f32 %v1304_v28, %v1308_v39 }
 0x4f1   : > { %v1310_v41 = vmul.f32 1.442695, %v1309_v40 }
 0x4f3   : > { %2340 = vpow2.f32 %v1310_v41 }
 0x4fd   : > { %v2341_v45 = vpop.eup %2340 }
 0x4fe   : > { %1312 = vadd.xlane.f32.xlu0 %v2341_v45 }
 0x514   : > { %1054 = vrot.lane.b32.xlu0 %v2685_v19, %s2437_s17  ;;  %v2325_v19 = vld [vmem:[%s641_s6 + $0x8] sm:$0xff]   ;;  %s628_s17 = scalar_lea.vmem %s2826_s5, %s2598_s29  ;;  %s592_s6 = scalar_lea.vmem [#allocation3], %s1894_s22 }
 0x515   : > { %v2328_v30 = vld [vmem:[%s628_s17] sm:$0xff]   ;;  %v2329_v39 = vld [vmem:[%s628_s17 + $0x8] sm:$0xff]   ;;  %s2358_s22 = scalar_lea.vmem %s2357_s14, 256 }
 0x577   : > { %v1136_v55 = vpop.xlane.xlu0 %1135 }
 0x578   : > { %2342 = vrcp.f32 %v1136_v55  ;;  %vm1137_vm10 = vcmp.gt.f32.partialorder %v1136_v55, 0.0 }
 0x582   : > { %v2343_v56 = vpop.eup %2342 }
 0x583   : > { %v1139_v57 = vsel %vm1137_vm10, %v2343_v56, 0.0 }
 0x584   : > { %v1140_v58 = vmul.f32 %v2339_v37, %v1139_v57 }
 0x586   : > { %v1141_v59 = vpack.c.bf16 %v1140_v58, %v1140_v58 }
 0x588   : > { %2164 = vmatmul.mubr.bf16.vlgmr.msra.gmra.mrb[12].mxu1 %v1141_v59 }
 0x589   : > { %2197 = vmatprep.mubr.msk.bf16.mxu1 %vm2433_vm0, %v2432_v1  ;;  %2194 = vmatpush3.bf16.msra.mxu1 %v2322_v7 }
 0x58a   : > { %2195 = vmatprep.subr.bf16.mxu1 %v2432_v1 }
 0x58b   : > { %v1313_v60 = vpop.xlane.xlu0 %1312 }
 0x58c   : > { %2344 = vrcp.f32 %v1313_v60  ;;  %vm1314_vm12 = vcmp.gt.f32.partialorder %v1313_v60, 0.0 }
 0x58d   : > { %2196 = vmatpush3.bf16.msra.mxu1 %v2323_v8 }
 0x58e   : > { %2201 = vmatprep.subr.bf16.mxu1 %v2432_v1 }
 0x58f   : > { %v1055_v61 = vpop.permute.xlu0 %1054 }
 0x590   : > { %1058 = vst.msk [vmem:[#allocation2] sm:$0xff] %vm1057_vm11, %v1055_v61 }
 0x596   : > { %v2345_v62 = vpop.eup %2344 }
 0x597   : > { %v1316_v63 = vsel %vm1314_vm12, %v2345_v62, 0.0 }
 0x598   : > { %v1317_v0 = vmul.f32 %v2341_v45, %v1316_v63 }
 0x59a   : > { %v1318_v2 = vpack.c.bf16 %v1317_v0, %v1317_v0 }
 0x59c   : > { %2190 = vmatmul.mubr.bf16.vlgmr.msra.gmra.mrb[16].mxu0 %v1318_v2 }
 0x59d   : > { %2213 = vmatprep.mubr.msk.bf16.mxu0 %vm2433_vm0, %v2432_v1  ;;  %2210 = vmatpush3.bf16.msra.mxu0 %v2326_v20 }
 0x59e   : > { %2211 = vmatprep.subr.bf16.mxu0 %v2432_v1 }
 0x5a1   : > { %2212 = vmatpush3.bf16.msra.mxu0 %v2327_v29 }
 0x65b   : > { %v1224_v3 = vpop.f32.mrb[12].mxu1 }
 0x65c   : > { %1231 = vrot.lane.b32.xlu0 %v1224_v3, %s2438_s16  ;;  %v2165_v4 = vpop.f32.mrb[13].mxu1 }
 0x65d   : > { %v1227_v5 = vpop.f32.mrb[14].mxu1 }
 0x65e   : > { %v2166_v6 = vpop.f32.mrb[15].mxu1 }
 0x66f   : > { %v1401_v9 = vpop.f32.mrb[16].mxu0 }
 0x670   : > { %1408 = vrot.lane.b32.xlu1 %v1401_v9, %s2439_s21  ;;  %v2191_v10 = vpop.f32.mrb[17].mxu0  ;;  %s1710_s21 = sshll.u32 %s592_s6, 4  ;;  %s2776_s21 = int_to_ptr.vmem [resolvable:$true] %s1710_s21 }
 0x671   : > { %v1404_v11 = vpop.f32.mrb[18].mxu0  ;;  %s2352_s29 = scalar_lea.vmem %s2776_s21, 128  ;;  %p2359_p1 = scmp.lt.s32.totalorder %s2776_s21, %s2357_s14 }
 0x672   : > { %v2192_v12 = vpop.f32.mrb[19].mxu0  ;;  %p2353_p12 = scmp.ne.s32.totalorder %s2776_s21, %s2352_s29  ;;  %p2360_p2 = scmp.lt.s32.totalorder %s2358_s22, %s2352_s29 }
 0x674   : > { %p2354_p13 = pnand %p2353_p12, %p2551_p4  ;;  %p2361_p3 = por %p2360_p2, %p2359_p1 }
 0x676   : > { %p2355_p0 = pneg %p2354_p13 }
 0x678   : > { %p2362_p5 = pnand %p2361_p3, %p2355_p0 }
 0x6ce   : > { %v1232_v13 = vpop.permute.xlu0 %1231 }
 0x6cf   : > { %1235 = vst.msk [vmem:[#allocation2] sm:$0xff] %vm1234_vm13, %v1232_v13 }
 0x6e2   : > { %v1409_v14 = vpop.permute.xlu1 %1408 }
 0x6e3   : > { %1412 = vst.msk [vmem:[#allocation2] sm:$0xff] %vm1411_vm14, %v1409_v14 }
 0x6ea   : > { %v1413_v15 = vld [vmem:[#allocation2] sm:$0xff] }
 0x6eb   : > { %v1414_v18 = vpack.c.bf16 %v1413_v15, %v1413_v15 }
 0x6ed   : > { %2198 = vmatmul.mubr.msk.bf16.vlgmr.msra.gmra.mrb[16].mxu1 %vm664_vm1, %v1414_v18 }
 0x6ee   : > { %2202 = vmatpush3.bf16.msra.mxu1 %v2324_v17  ;;  %2205 = vmatprep.mubr.msk.bf16.mxu1 %vm2433_vm0, %v2432_v1 }
 0x6ef   : > { %2203 = vmatprep.subr.bf16.mxu1 %v2432_v1 }
 0x6f2   : > { %2204 = vmatpush3.bf16.msra.mxu1 %v2325_v19 }
 0x6f3   : > { %2217 = vmatprep.subr.bf16.mxu1 %v2432_v1 }
 0x7c0   : > { %v1475_v22 = vpop.f32.mrb[16].mxu1 }
 0x7c1   : > { %v1476_v23 = vadd.f32 %v1998_v21, %v1475_v22  ;;  %v2199_v24 = vpop.f32.mrb[17].mxu1 }
 0x7c2   : > { %v1478_v25 = vpop.f32.mrb[18].mxu1 }
 0x7c3   : > { %v1481_v26 = vmax.f32 %v1476_v23, 0.0  ;;  %v2200_v27 = vpop.f32.mrb[19].mxu1 }
 0x7c5   : > { %v1482_v28 = vpack.c.bf16 %v1481_v26, %v1481_v26 }
 0x7c7   : > { %2206 = vmatmul.mubr.msk.bf16.vlgmr.msra.gmra.mrb[20].mxu1 %vm664_vm1, %v1482_v28 }
 0x7c8   : > { %2221 = vmatprep.mubr.msk.bf16.mxu1 %vm2433_vm0, %v2432_v1  ;;  %2218 = vmatpush3.bf16.msra.mxu1 %v2328_v30 }
 0x7c9   : > { %2219 = vmatprep.subr.bf16.mxu1 %v2432_v1  ;;  %v2006_v1 = vld [vmem:[%s2833_s12] ss:$0 sm:$0xff] }
 0x7cc   : > { %2220 = vmatpush3.bf16.msra.mxu1 %v2329_v39 }
 0x89a   : > { %v1543_v32 = vpop.f32.mrb[20].mxu1 }
 0x89b   : > { %v1544_v33 = vadd.f32 %v2002_v31, %v1543_v32  ;;  %v2207_v34 = vpop.f32.mrb[21].mxu1 }
 0x89c   : > { %v1546_v35 = vpop.f32.mrb[22].mxu1 }
 0x89d   : > { %v1549_v36 = vadd.f32 %v1544_v33, %v1413_v15  ;;  %v2208_v37 = vpop.f32.mrb[23].mxu1 }
 0x89f   : > { %v1550_v38 = vpack.c.bf16 %v1549_v36, %v1549_v36 }
 0x8a1   : > { %2214 = vmatmul.mubr.msk.bf16.vlgmr.msra.gmra.mrb[20].mxu0 %vm664_vm1, %v1550_v38 }
 0x974   : > { %v1611_v40 = vpop.f32.mrb[20].mxu0 }
 0x975   : > { %v1612_v41 = vadd.f32 %v2006_v1, %v1611_v40  ;;  %v2215_v42 = vpop.f32.mrb[21].mxu0 }
 0x976   : > { %v1614_v43 = vpop.f32.mrb[22].mxu0 }
 0x977   : > { %v1617_v44 = vpack.c.bf16 %v1612_v41, %v1612_v41  ;;  %v2216_v45 = vpop.f32.mrb[23].mxu0 }
 0x979   : > { %2222 = vmatmul.mubr.msk.bf16.vlgmr.msra.gmra.mrb[24].mxu1 %vm664_vm1, %v1617_v44 }
 0xa4c   : > { %v1671_v46 = vpop.f32.mrb[24].mxu1 }
 0xa4d   : > { %v1677_v47 = vmul.f32 0.17677669, %v1671_v46  ;;  %v2223_v48 = vpop.f32.mrb[25].mxu1 }
 0xa4e   : > { %v1674_v49 = vpop.f32.mrb[26].mxu1 }
 0xa4f   : > { %2346 = vtanh.f32 %v1677_v47  ;;  %v2224_v50 = vpop.f32.mrb[27].mxu1 }
 0xa59   : > { %v2347_v51 = vpop.eup %2346 }
 0xa5a   : > { %v1679_v52 = vmul.f32 10.0, %v2347_v51 }
 0xa5c   : > { %v1680_v53 = vadd.f32 %v1679_v52, %v2629_v16 }
 0xa5e   : > { %1681 = vmax.xlane.f32.xlu0 %v1680_v53 }
 0xaeb   : > { %v1682_v54 = vpop.xlane.xlu0 %1681 }
 0xaec   : > { %vm1683_vm15 = vcmp.eq.f32.partialorder %v1682_v54, -inf }
 0xaed   : > { %v1684_v55 = vsel %vm1683_vm15, 0.0, %v1682_v54 }
 0xaee   : > { %v1685_v56 = vsub.f32 %v1680_v53, %v1684_v55 }
 0xaf0   : > { %v1686_v57 = vmul.f32 1.442695, %v1685_v56 }
 0xaf2   : > { %2348 = vpow2.f32 %v1686_v57 }
 0xafc   : > { %v2349_v58 = vpop.eup %2348 }
 0xafd   : > { %1688 = vadd.xlane.f32.xlu1 %v2349_v58 }
 0xb8a   : > { %v1689_v59 = vpop.xlane.xlu1 %1688 }
 0xb8b   : > { %2350 = vrcp.f32 %v1689_v59  ;;  %vm1690_vm0 = vcmp.gt.f32.partialorder %v1689_v59, 0.0 }
 0xb95   : > { %v2351_v60 = vpop.eup %2350 }
 0xb96   : > { %v1692_v16 = vsel %vm1690_vm0, %v2351_v60, 0.0 }
 0xb97   : > { %v1693_v61 = vmul.f32 %v2349_v58, %v1692_v16 }
 0xb99   : > { %1694 = vst [vmem:[%s592_s6] sm:$0xff] %v1693_v61 }
 0xb9a   : > { %2365 = shalt.err (!%p2362_p5)
}
 0xb9b   : > { %s2366_s15 = scalar_lea.hbm %s2774_s23, 128  ;;  %s2370_s17 = scalar_lea.hbm %s2834_s13, 256 }
 0xb9c   : > { %p2367_p6 = scmp.ne.s32.totalorder %s2774_s23, %s2366_s15  ;;  %p2371_p10 = scmp.lt.u32.totalorder %s2774_s23, %s2834_s13 }
 0xb9d   : > { %p2372_p11 = scmp.lt.u32.totalorder %s2370_s17, %s2366_s15  ;;  %p2374_p13 = scmp.lt.u32.totalorder %s2366_s15, %s2774_s23 }
 0xb9e   : > { %p2368_p7 = pnand %p2367_p6, %p2551_p4 }
 0xb9f   : > { %p2373_p12 = por %p2372_p11, %p2371_p10 }
 0xba0   : > { %p2369_p9 = pneg %p2368_p7 }
 0xba1   : > { %p2375_p0 = por %p2374_p13, %p2373_p12 }
 0xba3   : > { %p2376_p1 = pnand %p2375_p0, %p2369_p9 }
 0xba5   : > { %2379 = shalt.err (!%p2376_p1)
}
 0xba6   : > { %2225 = dma.vmem_to_hbm [thread:$0]  (%p2551_p4), %s2776_s21, 128, %s2774_s23, %s1696_s24  }
 0xba7 PF: > { %p2231_p2 = scmp.ge.s32.totalorder %s2430_s30, 2  ;;  %s1722_s29 = sand.u32 1, %s2410_s25  }
 0xba8   : > { %s1723_s14 = scalar_lea.sflag [#allocation4], %s1722_s29 }
 0xba9   : > { %p2228_p3 = pnand %p2231_p2, %p2558_p8 }
 0xbab   : > { %2405 = dma.done.wait (!%p2228_p3), %s1723_s14, 128  }
 0xbac   : > { %2407 = vsyncadd (!%p2228_p3), %s1723_s14, 4294967168  ;;  %s26_s30 = sadd.s32 1, %s2430_s30   ;;  %s2844_s18 = sld [smem:[#allocation8_spill]] }
 0xbad   : > { %p23_p5 = scmp.ge.s32.totalorder %s26_s30, 4   ;;  %s2845_s28 = sld [smem:[#allocation6_spill]] }
 0xbae   : > { %s2846_s29 = sld [smem:[#allocation7_spill]]  ;;  %s2847_s25 = smov %s2414_s26 }
 0xbaf   : > { %s2848_s26 = smov %s2418_s27  ;;  %25 = sbr.rel (!%p23_p5) target bundleno = 6 (0x6), region = 140 }
 0xbb2   : > { %s2849_s27 = smov %s2844_s18 }
 0xbb6   :  { %1728 = vsyncpa [#allocation4], 1 }
 0xbb7   :  { %1730 = vsyncpa [#allocation4 + $0x1], 1 }

</bundles_post_ra>
